<compile_context>
chip_gen: v5e
topology: v5e:2x2
jax: 0.10.0
libtpu: 0.0.40
codegen_flags: <defaults>
</compile_context>

<pallas_src>
import jax
import jax.numpy as jnp
from jax import lax
from jax.experimental import pallas as pl
from jax.experimental.pallas import tpu as pltpu

LANES = 128
MAX_TILE_BYTES_PER_BUFFER = 4 * 1024 * 1024   # per input, per pipeline buffer
VMEM_LIMIT_BYTES = 32 * 1024 * 1024           # 2 in x 2 buf x 4 MiB + slack

_NUM_TC_CACHE = None


def _num_tensorcores() -> int:
    """TensorCores per chip: 2 on v7x, 1 on v5e/v6e (defensive default 1)."""
    global _NUM_TC_CACHE
    if _NUM_TC_CACHE is None:
        nc = 1
        try:
            dev = jax.devices()[0]
            kind = (getattr(dev, "device_kind", "") or "").lower()
            if dev.platform == "tpu" and "v7" in kind:
                nc = 2
        except Exception:
            nc = 1
        _NUM_TC_CACHE = nc
    return _NUM_TC_CACHE


def _make_sumsq_kernel(tile_rows, acc_rows, steps_per_split, rows_total,
                       needs_mask):
    """Kernel accumulating per-split sum of squared diffs into the out block."""
    folds = tile_rows // acc_rows

    def kernel(pred_ref, gt_ref, out_ref):
        i = pl.program_id(1)  # reduction axis (last, "arbitrary")

        @pl.when(i == 0)
        def _():
            out_ref[...] = jnp.zeros_like(out_ref)

        d = gt_ref[...].astype(jnp.float32) - pred_ref[...].astype(jnp.float32)
        d2 = d * d

        if needs_mask:
            # Unclamped global block index: rows past rows_total (partial last
            # block, or a duplicated clamped block on the 2-split path) -> 0.
            blk = pl.program_id(0) * steps_per_split + i
            start = blk * tile_rows
            is_ragged = start + tile_rows > rows_total

            @pl.when(is_ragged)
            def _():
                local = lax.broadcasted_iota(jnp.int32, (tile_rows, LANES), 0)
                d2m = jnp.where(start + local < rows_total, d2, 0.0)
                out_ref[...] += jnp.sum(
                    d2m.reshape(folds, acc_rows, LANES), axis=0)[None]

            @pl.when(jnp.logical_not(is_ragged))
            def _():
                out_ref[...] += jnp.sum(
                    d2.reshape(folds, acc_rows, LANES), axis=0)[None]
        else:
            # Interior / full tiles: pure vreg adds, no mask work at all.
            out_ref[...] += jnp.sum(
                d2.reshape(folds, acc_rows, LANES), axis=0)[None]

    return kernel


def heatmap_loss(pred: jax.Array, gt: jax.Array, *, max_tile_rows=None):
    """Pallas implementation of torch.dist(gt, pred, p=2). Returns f32 scalar."""
    assert pred.shape == gt.shape, "pred/gt shapes must match"

    n = pred.size
    p_flat = pred.reshape(-1)
    g_flat = gt.reshape(-1)

    rows_total = n // LANES
    main_n = rows_total * LANES

    # Tiny inputs (< one (8,128) tile): pure JAX, not worth a kernel launch.
    if rows_total < 8:
        d = g_flat.astype(jnp.float32) - p_flat.astype(jnp.float32)
        return jnp.sqrt(jnp.sum(d * d))

    # Sub-128 element tail (usually empty) handled in plain JAX - no full pad.
    tail_sumsq = jnp.float32(0.0)
    if main_n != n:
        dt = g_flat[main_n:].astype(jnp.float32) - p_flat[main_n:].astype(jnp.float32)
        tail_sumsq = jnp.sum(dt * dt)

    p2d = p_flat[:main_n].reshape(rows_total, LANES)
    g2d = g_flat[:main_n].reshape(rows_total, LANES)

    itemsize = jnp.dtype(pred.dtype).itemsize
    # Sublane packing alignment: 8 rows for 4-byte, 16 for 2-byte, 32 for 1-byte.
    align = max(8, 32 // itemsize)
    # Tile rows scale with 4/itemsize at a fixed VMEM byte budget per buffer.
    cap = (max_tile_rows if max_tile_rows is not None
           else MAX_TILE_BYTES_PER_BUFFER // (LANES * itemsize))
    cap = max(align, (cap // align) * align)
    tile_rows = min(cap, ((rows_total + align - 1) // align) * align)

    num_blocks = pl.cdiv(rows_total, tile_rows)
    # 1 split on single-TC chips (v5e/v6e): no duplicated clamped-block DMA.
    # 2 splits on v7x so the leading "parallel" axis shards across both TCs.
    # TODO(synk): if plain "parallel" does not core-shard on v7x, switch this
    # axis to pltpu.CORE_PARALLEL after verifying codegen.
    num_splits = min(_num_tensorcores(), num_blocks)
    steps_per_split = pl.cdiv(num_blocks, num_splits)
    last_block = num_blocks - 1
    needs_mask = (num_splits * steps_per_split * tile_rows) != rows_total

    # Accumulator height: 32 rows (4 vregs -> 4 independent add chains) when
    # the tile folds evenly, otherwise 16 or 8.
    acc_rows = 32 if tile_rows % 32 == 0 else (16 if tile_rows % 16 == 0 else 8)

    def in_map(c, i):
        # Clamp so we never request a fully out-of-bounds block; duplicated /
        # partial blocks contribute 0 via the gated in-kernel mask.
        return (jnp.minimum(c * steps_per_split + i, last_block), 0)

    kernel = _make_sumsq_kernel(tile_rows, acc_rows, steps_per_split,
                                rows_total, needs_mask)

    partials = pl.pallas_call(
        kernel,
        out_shape=jax.ShapeDtypeStruct((num_splits, acc_rows, LANES), jnp.float32),
        grid_spec=pltpu.PrefetchScalarGridSpec(
            num_scalar_prefetch=0,
            grid=(num_splits, steps_per_split),
            in_specs=[
                pl.BlockSpec((tile_rows, LANES), in_map),
                pl.BlockSpec((tile_rows, LANES), in_map),
            ],
            # Lane-dense output block; doubles as the resident accumulator.
            out_specs=pl.BlockSpec((1, acc_rows, LANES), lambda c, i: (c, 0, 0)),
        ),
        compiler_params=pltpu.CompilerParams(
            dimension_semantics=("parallel", "arbitrary"),
            vmem_limit_bytes=VMEM_LIMIT_BYTES,
        ),
        cost_estimate=pl.CostEstimate(
            flops=3 * main_n,
            transcendentals=0,
            bytes_accessed=2 * main_n * itemsize,
        ),
    )(p2d, g2d)

    # Single tiny cross-lane reduce + sqrt in plain JAX.
    return jnp.sqrt(jnp.sum(partials) + tail_sumsq)


if __name__ == "__main__":
    key = jax.random.PRNGKey(0)
    k1, k2, k3, k4, k5, k6 = jax.random.split(key, 6)

    # Small heatmap-like shapes (NCHW): batch=2, channels=4, spatial=16x16.
    pred = jax.random.normal(k1, (2, 4, 16, 16), dtype=jnp.float32)
    gt = jax.random.uniform(k2, (2, 4, 16, 16), dtype=jnp.float32)
    loss = jax.block_until_ready(heatmap_loss(pred, gt))
    ref = jnp.sqrt(jnp.sum((gt - pred) ** 2))
    assert jnp.allclose(loss, ref, rtol=1e-5, atol=1e-5), (loss, ref)

    # Multi-block + ragged-last-block path (and clamped duplicate block on
    # 2-TC chips), forced via a small tile cap.
    pred2 = jax.random.normal(k3, (4, 8, 48, 48), dtype=jnp.float32)
    gt2 = jax.random.uniform(k4, (4, 8, 48, 48), dtype=jnp.float32)
    loss2 = jax.block_until_ready(heatmap_loss(pred2, gt2, max_tile_rows=256))
    ref2 = jnp.sqrt(jnp.sum((gt2 - pred2) ** 2))
    assert jnp.allclose(loss2, ref2, rtol=1e-5, atol=1e-5), (loss2, ref2)

    # Non-multiple-of-128 element count -> in-JAX tail + masked partial block.
    pred3 = jax.random.normal(k5, (2, 3, 17, 19), dtype=jnp.float32)
    gt3 = jax.random.uniform(k6, (2, 3, 17, 19), dtype=jnp.float32)
    loss3 = jax.block_until_ready(heatmap_loss(pred3, gt3))
    ref3 = jnp.sqrt(jnp.sum((gt3 - pred3) ** 2))
    assert jnp.allclose(loss3, ref3, rtol=1e-5, atol=1e-5), (loss3, ref3)

    print("KERNEL_OK")
</pallas_src>

<mosaic_0001>
module attributes {stable_mosaic.version = 11 : i64} {
  func.func @kernel(%arg0: i32, %arg1: i32, %arg2: memref<16x128xf32, #tpu.memory_space<vmem>>, %arg3: memref<16x128xf32, #tpu.memory_space<vmem>>, %arg4: memref<1x16x128xf32, #tpu.memory_space<vmem>>) attributes {dimension_semantics = [#tpu.dimension_semantics<parallel>, #tpu.dimension_semantics<arbitrary>], iteration_bounds = array<i64: 1, 1>, scalar_prefetch = 0 : i64, scratch_operands = 0 : i64, tpu.core_type = #tpu.core_type<tc>, window_params = [{transform_indices = @transform_0, window_bounds = array<i64: 16, 128>}, {transform_indices = @transform_1, window_bounds = array<i64: 16, 128>}, {transform_indices = @transform_2, window_bounds = array<i64: 1, 16, 128>}]} {
    %c0_i32 = arith.constant 0 : i32
    %0 = arith.cmpi eq, %arg1, %c0_i32 : i32
    %1 = arith.extui %0 : i1 to i32
    %c0_i32_0 = arith.constant 0 : i32
    %2 = arith.cmpi ne, %1, %c0_i32_0 : i32
    scf.if %2 {
      %cst_10 = arith.constant 0.000000e+00 : f32
      %13 = vector.broadcast %cst_10 : f32 to vector<1x16x128xf32>
      %c0_11 = arith.constant 0 : index
      %c0_12 = arith.constant 0 : index
      %c0_13 = arith.constant 0 : index
      %14 = vector.load %arg4[%c0_11, %c0_12, %c0_13] : memref<1x16x128xf32, #tpu.memory_space<vmem>>, vector<1x16x128xf32>
      tpu.vector_store %arg4[%c0_11, %c0_12, %c0_13], %13 {strides = array<i32>} : memref<1x16x128xf32, #tpu.memory_space<vmem>>, vector<1x16x128xf32>,
    } else {
    }
    %c0 = arith.constant 0 : index
    %c0_1 = arith.constant 0 : index
    %3 = vector.load %arg3[%c0, %c0_1] : memref<16x128xf32, #tpu.memory_space<vmem>>, vector<16x128xf32>
    %c0_2 = arith.constant 0 : index
    %c0_3 = arith.constant 0 : index
    %4 = vector.load %arg2[%c0_2, %c0_3] : memref<16x128xf32, #tpu.memory_space<vmem>>, vector<16x128xf32>
    %5 = arith.subf %3, %4 : vector<16x128xf32>
    %6 = arith.mulf %5, %5 : vector<16x128xf32>
    %c0_4 = arith.constant 0 : index
    %c0_5 = arith.constant 0 : index
    %c0_6 = arith.constant 0 : index
    %7 = vector.load %arg4[%c0_4, %c0_5, %c0_6] : memref<1x16x128xf32, #tpu.memory_space<vmem>>, vector<1x16x128xf32>
    %8 = vector.shape_cast %6 : vector<16x128xf32> to vector<1x16x128xf32>
    %cst = arith.constant dense<0.000000e+00> : vector<16x128xf32>
    %9 = vector.multi_reduction <add>, %8, %cst [0] : vector<1x16x128xf32> to vector<16x128xf32>
    %10 = vector.shape_cast %9 : vector<16x128xf32> to vector<1x16x128xf32>
    %11 = arith.addf %7, %10 : vector<1x16x128xf32>
    %c0_7 = arith.constant 0 : index
    %c0_8 = arith.constant 0 : index
    %c0_9 = arith.constant 0 : index
    %12 = vector.load %arg4[%c0_7, %c0_8, %c0_9] : memref<1x16x128xf32, #tpu.memory_space<vmem>>, vector<1x16x128xf32>
    tpu.vector_store %arg4[%c0_7, %c0_8, %c0_9], %11 {strides = array<i32>} : memref<1x16x128xf32, #tpu.memory_space<vmem>>, vector<1x16x128xf32>,
    return
  }
  func.func @transform_0(%arg0: i32, %arg1: i32) -> (i32, i32) {
    %c1_i32 = arith.constant 1 : i32
    %0 = arith.muli %arg0, %c1_i32 : i32
    %1 = arith.addi %0, %arg1 : i32
    %c0_i32 = arith.constant 0 : i32
    %2 = arith.minsi %1, %c0_i32 : i32
    %c0_i32_0 = arith.constant 0 : i32
    %c0_i32_1 = arith.constant 0 : i32
    return %2, %c0_i32_0 : i32, i32
  }
  func.func @transform_1(%arg0: i32, %arg1: i32) -> (i32, i32) {
    %c1_i32 = arith.constant 1 : i32
    %0 = arith.muli %arg0, %c1_i32 : i32
    %1 = arith.addi %0, %arg1 : i32
    %c0_i32 = arith.constant 0 : i32
    %2 = arith.minsi %1, %c0_i32 : i32
    %c0_i32_0 = arith.constant 0 : i32
    %c0_i32_1 = arith.constant 0 : i32
    return %2, %c0_i32_0 : i32, i32
  }
  func.func @transform_2(%arg0: i32, %arg1: i32) -> (i32, i32, i32) {
    %c0_i32 = arith.constant 0 : i32
    %c0_i32_0 = arith.constant 0 : i32
    %c0_i32_1 = arith.constant 0 : i32
    return %arg0, %c0_i32, %c0_i32_0 : i32, i32, i32
  }
}

</mosaic_0001>

<bundles_post_ra>
// kernel: tpu_custom_call.1
= control target key start
LH: loop header
LB: loop body
LE: loop exit
PB: predicated region body
PF: predicated region fallthrough
CT: control target
= control target key end

     0   :  { %7 = vsyncpa [#allocation3], 0  ;;  %s232_s0 = inlined_call_operand.hbm [shape: f32[16,128], index: 0, kind: input, shape index: {}]   ;;  %s233_s1 = inlined_call_operand.hbm [shape: f32[16,128], index: 1, kind: input, shape index: {}]   ;;  %s234_s2 = inlined_call_operand.hbm [shape: f32[1,16,128], index: 2, kind: output, shape index: {}]  }
   0x1   :  { %8 = vsyncpa [#allocation6], 0 }
   0x2   :  { %9 = vsyncpa [#allocation4], 0  ;;  %s20_s11 = sshll.u32 %s232_s0, 4  ;;  %s194_s12 = smov [#allocation2]   ;;  %s21_s11 = int_to_ptr.hbm [resolvable:$true] %s20_s11 }
   0x3   :  { %s22_s13 = sshll.u32 %s194_s12, 4  ;;  %s39_s16 = sshll.u32 %s233_s1, 4  ;;  %s23_s13 = int_to_ptr.vmem [resolvable:$true] %s22_s13  ;;  %s40_s16 = int_to_ptr.hbm [resolvable:$true] %s39_s16 }
   0x4   :  { %s195_s17 = smov 128   ;;  %s196_s18 = smov 8  }
   0x5   :  { %28 = dma.hbm_to_vmem [thread:$0]  %s21_s11, 256, %s23_s13, [#allocation3], %s195_s17, %s195_s17, %s196_s18  }
   0x6   :  { %s197_s19 = smov [#allocation5]  }
   0x7   :  { %s41_s20 = sshll.u32 %s197_s19, 4  ;;  %s42_s20 = int_to_ptr.vmem [resolvable:$true] %s41_s20 }
   0x8   :  { %47 = dma.hbm_to_vmem [thread:$0]  %s40_s16, 256, %s42_s20, [#allocation6], %s195_s17, %s195_s17, %s196_s18  }
   0x9   :  { %188 = dma.done.wait [#allocation3], 256  }
   0xa   :  { %189 = vsyncadd [#allocation3], 4294967040 }
   0xb   :  { %190 = dma.done.wait [#allocation6], 256  }
   0xc   :  { %191 = vsyncadd [#allocation6], 4294967040  ;;  %v70_v0 = vld [vmem:[#allocation5] sm:$0xff]  ;;  %v72_v1 = vld [vmem:[#allocation2] sm:$0xff]  ;;  %s198_s0 = smov [#allocation7]   ;;  %s92_s23 = sshll.u32 %s234_s2, 4  ;;  %s93_s23 = int_to_ptr.hbm [resolvable:$true] %s92_s23 }
   0xd   :  { %v71_v2 = vld [vmem:[#allocation5 + $0x8] sm:$0xff]  ;;  %v74_v3 = vsub.f32 %v70_v0, %v72_v1  ;;  %v73_v4 = vld [vmem:[#allocation2 + $0x8] sm:$0xff]  ;;  %s90_s1 = sshll.u32 %s198_s0, 4  ;;  %s91_s1 = int_to_ptr.vmem [resolvable:$true] %s90_s1 }
   0xe   :  { %v75_v5 = vsub.f32 %v71_v2, %v73_v4 }
   0xf   :  { %v76_v6 = vmul.f32 %v74_v3, %v74_v3 }
  0x10   :  { %v77_v7 = vmul.f32 %v75_v5, %v75_v5 }
  0x11   :  { %84 = vst [vmem:[#allocation7] sm:$0xff] %v76_v6 }
  0x12   :  { %85 = vst [vmem:[#allocation7 + $0x8] sm:$0xff] %v77_v7 }
  0x13   :  { %98 = dma.vmem_to_hbm [thread:$0]  %s91_s1, 256, %s93_s23, [#allocation4], %s195_s17, %s195_s17, %s196_s18  }
  0x14   :  { %192 = dma.done.wait [#allocation4], 256  }
  0x15   :  { %193 = vsyncadd [#allocation4], 4294967040 }
  0x16   :  { %103 = vsyncpa [#allocation3], 1 }
  0x17   :  { %104 = vsyncpa [#allocation6], 1 }
  0x18   :  { %105 = vsyncpa [#allocation4], 1 }

</bundles_post_ra>
